<compile_context>
chip_gen: v7x
topology: tpu7x:2x2x1
jax: 0.10.0
libtpu: 0.0.40
codegen_flags: <defaults>
</compile_context>

<pallas_src>
import jax
import jax.numpy as jnp
from jax.experimental import pallas as pl
from jax.experimental.pallas import tpu as pltpu

_MIB = 1024 * 1024


def _round_up(a: int, b: int) -> int:
    return ((a + b - 1) // b) * b


def _cdiv(a: int, b: int) -> int:
    return -(-a // b)


# ---------------------------------------------------------------------------
# Kernels
# ---------------------------------------------------------------------------
def _matmul_kernel_single_k(c_ref, x_ref, o_ref):
    """Whole contraction in one K block: write the MXU result directly."""
    o_ref[...] = jnp.dot(
        c_ref[...], x_ref[...], preferred_element_type=jnp.float32
    )


def _matmul_kernel_multi_k(c_ref, x_ref, o_ref):
    """(tm, tn) output tile; accumulate directly into the resident f32 output
    across the innermost (arbitrary) k axis — no scratch accumulator."""
    @pl.when(pl.program_id(2) == 0)
    def _():
        o_ref[...] = jnp.zeros_like(o_ref)

    o_ref[...] += jnp.dot(
        c_ref[...], x_ref[...], preferred_element_type=jnp.float32
    )


# ---------------------------------------------------------------------------
# Generation-aware tile selection
# ---------------------------------------------------------------------------
def _vmem_capacity_bytes() -> int:
    """Per-TensorCore VMEM capacity; conservative fallback if the query fails."""
    try:
        cap = int(getattr(pltpu.get_tpu_info(), "vmem_capacity_bytes", 0))
        if cap > 0:
            return cap
    except Exception:
        pass
    return 64 * _MIB  # smallest current part (v7x per-TC) -> always safe


def _chip_params():
    cap = _vmem_capacity_bytes()
    if cap <= 64 * _MIB:
        # v7x-class: 64 MiB VMEM per TC, 2 TensorCores per chip.
        return dict(num_tc=2, budget=30 * _MIB, limit_cap=46 * _MIB,
                    single_k_max=2048)
    # v5e / v6e: 128 MiB VMEM, single TensorCore.
    return dict(num_tc=1, budget=72 * _MIB, limit_cap=96 * _MIB,
                single_k_max=4096)


def _choose_tiles(n: int, d: int):
    p = _chip_params()
    num_tc, budget = p["num_tc"], p["budget"]

    d_pad0 = _round_up(d, 128)
    n_pad_m0 = _round_up(n, 8)

    # ---- K (contraction; lane dim of the C tile) -----------------------------
    if n <= p["single_k_max"]:
        tk = _round_up(n, 128)                 # lane-dense, MXU-aligned
        gk = 1
    else:
        gk = _cdiv(n, 2048)                    # ~2048-deep K blocks
        tk = _round_up(_cdiv(_round_up(n, 128), gk), 128)
        gk = _cdiv(n, tk)
    n_pad_k = gk * tk
    multi_k = gk > 1

    # ---- N (features): widest lane-dense tn the budget allows ----------------
    # Double-buffered working set: 2 * 4B * (tm*tk + tk*tn + tm*tn) <= budget.
    words = budget // 8
    gn = 1
    while True:
        tn = _round_up(_cdiv(d_pad0, gn), 128)
        rem = words - tk * tn
        tm_budget = rem // (tk + tn) if rem > 0 else 0
        if tm_budget >= 256 or tn <= 128:
            break
        gn += 1
    gn = _cdiv(d_pad0, tn)

    # ---- M (output rows): grow toward the budget; keep every TC fed ----------
    tm_cap = n_pad_m0 if num_tc == 1 else _round_up(_cdiv(n_pad_m0, num_tc), 8)
    tm_try = max(8, min(tm_cap, tm_budget, n_pad_m0))
    gm = _cdiv(n_pad_m0, tm_try)
    if n_pad_m0 >= 8 * num_tc:
        gm = max(gm, num_tc)                   # only forces 2 blocks on v7x
    tm = _round_up(_cdiv(n_pad_m0, gm), 8)

    # ---- Keep a few pipeline steps per core so DMA overlaps compute, --------
    # ---- but only while the split tiles stay large (>= 256) -----------------
    min_steps = 4 * num_tc
    while gm * gn * gk < min_steps:
        nt = _round_up(_cdiv(n_pad_m0, gm + 1), 8)
        if nt >= 256 and _cdiv(n_pad_m0, nt) > gm:
            gm = _cdiv(n_pad_m0, nt)
            tm = nt
            continue
        nt = _round_up(_cdiv(d_pad0, gn + 1), 128)
        if nt >= 256 and _cdiv(d_pad0, nt) > gn:
            gn = _cdiv(d_pad0, nt)
            tn = nt
            continue
        break

    n_pad_m = gm * tm
    d_pad = gn * tn

    vmem_bytes = 8 * (tm * tk + tk * tn + tm * tn)   # 2 bufs each, f32
    vmem_limit = min(max(int(vmem_bytes * 1.4), 32 * _MIB), p["limit_cap"])

    return dict(tm=tm, tk=tk, tn=tn, gm=gm, gn=gn, gk=gk,
                n_pad_m=n_pad_m, n_pad_k=n_pad_k, d_pad=d_pad,
                multi_k=multi_k, vmem_limit=vmem_limit)


# ---------------------------------------------------------------------------
# Forward
# ---------------------------------------------------------------------------
def self_expression_forward(coefficient: jax.Array, x: jax.Array) -> jax.Array:
    """y = coefficient @ x  via a tiled Pallas matmul.

    coefficient: (n, n) float32
    x:           (n, d) float32
    returns:     (n, d) float32
    """
    n, n2 = coefficient.shape
    assert n == n2, "Coefficient must be square (n, n)"
    nk_, d = x.shape
    assert nk_ == n, "x first dim must equal n"

    t = _choose_tiles(n, d)
    tm, tk, tn = t["tm"], t["tk"], t["tn"]
    gm, gn, gk = t["gm"], t["gn"], t["gk"]
    n_pad_m, n_pad_k, d_pad = t["n_pad_m"], t["n_pad_k"], t["d_pad"]

    # Zero-pad only when needed (zero K rows contribute nothing to the dot).
    c = coefficient
    if (n_pad_m, n_pad_k) != (n, n):
        c = jnp.pad(c, ((0, n_pad_m - n), (0, n_pad_k - n)))
    xp = x
    if (n_pad_k, d_pad) != (n, d):
        xp = jnp.pad(xp, ((0, n_pad_k - n), (0, d_pad - d)))

    if t["multi_k"]:
        grid = (gm, gn, gk)
        in_specs = [
            pl.BlockSpec((tm, tk), lambda i, j, k: (i, k)),  # Coefficient
            pl.BlockSpec((tk, tn), lambda i, j, k: (k, j)),  # x
        ]
        out_specs = pl.BlockSpec((tm, tn), lambda i, j, k: (i, j))
        kernel = _matmul_kernel_multi_k
        dims = ("parallel", "parallel", "arbitrary")
    else:
        grid = (gm, gn)
        in_specs = [
            pl.BlockSpec((tm, tk), lambda i, j: (i, 0)),     # Coefficient
            pl.BlockSpec((tk, tn), lambda i, j: (0, j)),     # x
        ]
        out_specs = pl.BlockSpec((tm, tn), lambda i, j: (i, j))
        kernel = _matmul_kernel_single_k
        dims = ("parallel", "parallel")

    y = pl.pallas_call(
        kernel,
        out_shape=jax.ShapeDtypeStruct((n_pad_m, d_pad), jnp.float32),
        grid_spec=pltpu.PrefetchScalarGridSpec(
            num_scalar_prefetch=0,
            grid=grid,
            in_specs=in_specs,
            out_specs=out_specs,
        ),
        compiler_params=pltpu.CompilerParams(
            dimension_semantics=dims,
            vmem_limit_bytes=t["vmem_limit"],
        ),
    )(c, xp)

    if (n_pad_m, d_pad) != (n, d):
        y = y[:n, :d]
    return y


class SelfExpression:
    """JAX/Pallas port of DSCNet's SelfExpression module."""

    def __init__(self, n: int):
        # Deterministic init, identical to the PyTorch module's __init__.
        self.coefficient = 0.0001 * jnp.ones((n, n), dtype=jnp.float32)

    def __call__(self, x: jax.Array) -> jax.Array:
        return self_expression_forward(self.coefficient, x)


if __name__ == "__main__":
    key = jax.random.PRNGKey(0)
    # Small shapes, deliberately NOT multiples of 128, to exercise padding.
    n, d = 96, 200
    x = jax.random.normal(key, (n, d), dtype=jnp.float32)

    mod = SelfExpression(n)
    fwd = jax.jit(self_expression_forward)
    y = jax.block_until_ready(fwd(mod.coefficient, x))

    # Reference with the same f32-accumulated matmul semantics as the kernel.
    y_ref = jnp.dot(mod.coefficient, x, preferred_element_type=jnp.float32)
    assert y.shape == (n, d)
    assert y.dtype == jnp.float32
    max_err = float(jnp.max(jnp.abs(y - y_ref)))
    assert jnp.allclose(y, y_ref, atol=2e-5, rtol=1e-4), max_err

    print("KERNEL_OK")
</pallas_src>

<mosaic_0001>
module attributes {stable_mosaic.version = 11 : i64} {
  func.func @_matmul_kernel_single_k(%arg0: i32, %arg1: i32, %arg2: memref<48x128xf32, #tpu.memory_space<vmem>>, %arg3: memref<128x256xf32, #tpu.memory_space<vmem>>, %arg4: memref<48x256xf32, #tpu.memory_space<vmem>>) attributes {dimension_semantics = [#tpu.dimension_semantics<parallel>, #tpu.dimension_semantics<parallel>], iteration_bounds = array<i64: 2, 1>, scalar_prefetch = 0 : i64, scratch_operands = 0 : i64, tpu.core_type = #tpu.core_type<tc>, window_params = [{transform_indices = @transform_0, window_bounds = array<i64: 48, 128>}, {transform_indices = @transform_1, window_bounds = array<i64: 128, 256>}, {transform_indices = @transform_2, window_bounds = array<i64: 48, 256>}]} {
    %c0 = arith.constant 0 : index
    %c0_0 = arith.constant 0 : index
    %0 = vector.load %arg2[%c0, %c0_0] : memref<48x128xf32, #tpu.memory_space<vmem>>, vector<48x128xf32>
    %c0_1 = arith.constant 0 : index
    %c0_2 = arith.constant 0 : index
    %1 = vector.load %arg3[%c0_1, %c0_2] : memref<128x256xf32, #tpu.memory_space<vmem>>, vector<128x256xf32>
    %cst = arith.constant dense<0.000000e+00> : vector<48x256xf32>
    %2 = tpu.matmul %0, %1, %cst {dimension_numbers = #tpu.dot_dimension_numbers<[1], [0], [0], [1], [0, 0, 1, 1], [], []>} : vector<48x128xf32>, vector<128x256xf32>, vector<48x256xf32> -> vector<48x256xf32>
    %c0_3 = arith.constant 0 : index
    %c0_4 = arith.constant 0 : index
    %3 = vector.load %arg4[%c0_3, %c0_4] : memref<48x256xf32, #tpu.memory_space<vmem>>, vector<48x256xf32>
    tpu.vector_store %arg4[%c0_3, %c0_4], %2 {strides = array<i32>} : memref<48x256xf32, #tpu.memory_space<vmem>>, vector<48x256xf32>,
    return
  }
  func.func @transform_0(%arg0: i32, %arg1: i32) -> (i32, i32) {
    %c0_i32 = arith.constant 0 : i32
    %c0_i32_0 = arith.constant 0 : i32
    return %arg0, %c0_i32 : i32, i32
  }
  func.func @transform_1(%arg0: i32, %arg1: i32) -> (i32, i32) {
    %c0_i32 = arith.constant 0 : i32
    %c0_i32_0 = arith.constant 0 : i32
    return %c0_i32, %arg1 : i32, i32
  }
  func.func @transform_2(%arg0: i32, %arg1: i32) -> (i32, i32) {
    %c0_i32 = arith.constant 0 : i32
    return %arg0, %arg1 : i32, i32
  }
}

</mosaic_0001>

<bundles_post_ra>
// kernel: self_expression_forward.1
= control target key start
LH: loop header
LB: loop body
LE: loop exit
PB: predicated region body
PF: predicated region fallthrough
CT: control target
= control target key end

     0   :  { %7 = vsyncpa [#allocation3], 0  ;;  %s878_s0 = inlined_call_operand.vmem [shape: f32[96,128], index: 0, kind: input, shape index: {}]   ;;  %s879_s1 = inlined_call_operand.vmem [shape: f32[128,256], index: 1, kind: input, shape index: {}]   ;;  %s880_s2 = inlined_call_operand.hbm [shape: f32[96,256], index: 2, kind: output, shape index: {}]  }
   0x1   :  { %9 = vsyncpa [#allocation3 + $0x1], 0  ;;  %s658_s9 = smov 0   ;;  %s660_s10 = smov 0  }
   0x2   :  { %s662_s11 = smov 0   ;;  %s664_s12 = smov 0  }
   0x3   :  { %s666_s13 = smov 0   ;;  %s668_s14 = smov 0  }
   0x4 LB: > { %s438_s15 = sadd.s32 4294967295, %s637_s14   ;;  %s439_s16 = sadd.s32 4294967294, %s637_s14   ;;  %s637_s14 = sphi %s668_s14, %s15_s14   ;;  %s633_s13 = sphi %s666_s13, %s887_s13   ;;  %s629_s12 = sphi %s664_s12, %s886_s12   ;;  %s625_s11 = sphi %s662_s11, %s885_s11   ;;  %s621_s10 = sphi %s660_s10, %s884_s10   ;;  %s617_s9 = sphi %s658_s9, %s883_s9  }
   0x5   : > { %s27_s17 = sadd.s32 1, %s633_s13  ;;  %s88_s18 = sadd.s32 1, %s625_s11 }
   0x6   : > { %p29_p0 = scmp.ge.s32.totalorder %s27_s17, 2  ;;  %p98_p1 = scmp.ne.s32.totalorder %s625_s11, %s621_s10 }
   0x7   : > { %p99_p2 = scmp.eq.s32.totalorder %s438_s15, 1  ;;  %p104_p3 = scmp.ne.s32.totalorder %s621_s10, %s617_s9 }
   0x8   : > { %s889_s17 = smov (%p29_p0, %s27_s17), 0  ;;  %p105_p5 = scmp.eq.s32.totalorder %s439_s16, 1 }
   0x9   : > { %p698_p4 = por %p99_p2, %p98_p1  ;;  %s83_s20 = ssub.s32 %s633_s13, %s889_s17 }
   0xa   : > { %p443_p6 = scmp.ge.s32.totalorder %s637_s14, 1  ;;  %p86_p7 = scmp.eq.s32.totalorder %s83_s20, 0 }
   0xb   : > { %p705_p8 = por %p105_p5, %p104_p3  ;;  %p141_p9 = scmp.lt.s32.totalorder %s637_s14, 3 }
   0xc   : > { %s711_s22 = scalar_select %p86_p7, %s625_s11, %s88_s18  }
   0xd   : > { %p142_p10 = pnand %p443_p6, %p141_p9 }
   0xe   : > { %v189_v0 = vld [vmem:[%s879_s1 + $0x8] sm:$0xff] (!%p142_p10)  ;;  %v191_v1 = vld [vmem:[%s879_s1 + $0x18] sm:$0xff] (!%p142_p10)  ;;  %v188_v2 = vld [vmem:[%s879_s1] sm:$0xff] (!%p142_p10)  ;;  %v639_v7 = vmov (!%p142_p10), 0.0   ;;  %s168_s3 = smul.u32 (!%p142_p10), 6, %s629_s12  ;;  %s640_s29 = smov (!%p142_p10), [#allocation2]  }
   0xf   : > { %145 = sbr.rel (%p142_p10) target bundleno = 285 (0x11d), region = 28  ;;  %v452_v3 = vpack.c.bf16 (!%p142_p10), %v191_v1, %v189_v0  ;;  %v190_v4 = vld [vmem:[%s879_s1 + $0x10] sm:$0xff] (!%p142_p10)  ;;  %v193_v5 = vld [vmem:[%s879_s1 + $0x28] sm:$0xff] (!%p142_p10)  ;;  %v195_v6 = vld [vmem:[%s879_s1 + $0x38] sm:$0xff] (!%p142_p10)  ;;  %284 = vmatprep.mubr.f32.mxu0 (!%p142_p10), %v639_v7  ;;  %302 = vmatprep.mubr.f32.mxu1 (!%p142_p10), %v639_v7  ;;  %s563_s30 = sshll.u32 (!%p142_p10), %s640_s29, 4  ;;  %s564_s30 = int_to_ptr.vmem [resolvable:$false] %s563_s30 }
  0x10   : > { %v454_v8 = vpack.c.bf16 (!%p142_p10), %v190_v4, %v188_v2  ;;  %v456_v9 = vpack.c.bf16 (!%p142_p10), %v195_v6, %v193_v5  ;;  %v192_v10 = vld [vmem:[%s879_s1 + $0x20] sm:$0xff] (!%p142_p10)  ;;  %v194_v11 = vld [vmem:[%s879_s1 + $0x30] sm:$0xff] (!%p142_p10)  ;;  %v197_v12 = vld [vmem:[%s879_s1 + $0x48] sm:$0xff] (!%p142_p10)  ;;  %p169_p11 = scmp.lt.s32.totalorder (!%p142_p10), %s168_s3, 11  ;;  %s451_s23 = smul.u32 (!%p142_p10), 1536, %s629_s12 }
  0x11   : > { %453 = vmatprep.subr.bf16.mxu0 (!%p142_p10), %v452_v3  ;;  %484 = vmatprep.subr.bf16.mxu1 (!%p142_p10), %v452_v3  ;;  %v199_v13 = vld [vmem:[%s879_s1 + $0x58] sm:$0xff] (!%p142_p10)  ;;  %v458_v14 = vpack.c.bf16 (!%p142_p10), %v194_v11, %v192_v10  ;;  %v196_v16 = vld [vmem:[%s879_s1 + $0x40] sm:$0xff] (!%p142_p10)  ;;  %v198_v17 = vld [vmem:[%s879_s1 + $0x50] sm:$0xff] (!%p142_p10)  ;;  %s565_s4 = scalar_lea.vmem (!%p142_p10), %s564_s30, 3072 }
  0x12   : > { %455 = vmatpush1.bf16.msra.mxu0 (!%p142_p10), %v454_v8  ;;  %492 = vmatpush1.bf16.msra.mxu1 (!%p142_p10), %v454_v8  ;;  %v460_v15 = vpack.c.bf16 (!%p142_p10), %v199_v13, %v197_v12  ;;  %v201_v18 = vld [vmem:[%s879_s1 + $0x68] sm:$0xff] (!%p142_p10)  ;;  %v203_v19 = vld [vmem:[%s879_s1 + $0x78] sm:$0xff] (!%p142_p10)  ;;  %v462_v20 = vpack.c.bf16 (!%p142_p10), %v198_v17, %v196_v16  ;;  %v200_v22 = vld [vmem:[%s879_s1 + $0x60] sm:$0xff] (!%p142_p10)  ;;  %s826_s27 = scalar_lea.hbm (!%p142_p10), %s880_s2, %s451_s23 }
  0x13   : > { %457 = vmatprep.subr.bf16.mxu0 (!%p142_p10), %v456_v9  ;;  %485 = vmatprep.subr.bf16.mxu1 (!%p142_p10), %v456_v9  ;;  %v464_v21 = vpack.c.bf16 (!%p142_p10), %v203_v19, %v201_v18  ;;  %v202_v23 = vld [vmem:[%s879_s1 + $0x70] sm:$0xff] (!%p142_p10)  ;;  %v205_v24 = vld [vmem:[%s879_s1 + $0x88] sm:$0xff] (!%p142_p10)  ;;  %v207_v25 = vld [vmem:[%s879_s1 + $0x98] sm:$0xff] (!%p142_p10) }
  0x14   : > { %v466_v26 = vpack.c.bf16 (!%p142_p10), %v202_v23, %v200_v22  ;;  %v468_v27 = vpack.c.bf16 (!%p142_p10), %v207_v25, %v205_v24  ;;  %v204_v28 = vld [vmem:[%s879_s1 + $0x80] sm:$0xff] (!%p142_p10)  ;;  %v206_v29 = vld [vmem:[%s879_s1 + $0x90] sm:$0xff] (!%p142_p10)  ;;  %v209_v30 = vld [vmem:[%s879_s1 + $0xa8] sm:$0xff] (!%p142_p10) }
  0x15   : > { %v211_v31 = vld [vmem:[%s879_s1 + $0xb8] sm:$0xff] (!%p142_p10)  ;;  %v470_v32 = vpack.c.bf16 (!%p142_p10), %v206_v29, %v204_v28  ;;  %v208_v34 = vld [vmem:[%s879_s1 + $0xa0] sm:$0xff] (!%p142_p10)  ;;  %v210_v35 = vld [vmem:[%s879_s1 + $0xb0] sm:$0xff] (!%p142_p10) }
  0x16   : > { %459 = vmatpush1.bf16.msra.mxu0 %v458_v14  ;;  %493 = vmatpush1.bf16.msra.mxu1 %v458_v14  ;;  %v472_v33 = vpack.c.bf16 %v211_v31, %v209_v30  ;;  %v213_v36 = vld [vmem:[%s879_s1 + $0xc8] sm:$0xff]  ;;  %v215_v37 = vld [vmem:[%s879_s1 + $0xd8] sm:$0xff]  ;;  %v474_v38 = vpack.c.bf16 %v210_v35, %v208_v34  ;;  %v212_v40 = vld [vmem:[%s879_s1 + $0xc0] sm:$0xff]  ;;  %s891_s3 = smov (!%p169_p11, %s168_s3), 11 }
  0x17   : > { %461 = vmatprep.subr.bf16.mxu0 %v460_v15  ;;  %486 = vmatprep.subr.bf16.mxu1 %v460_v15  ;;  %v476_v39 = vpack.c.bf16 %v215_v37, %v213_v36  ;;  %v214_v41 = vld [vmem:[%s879_s1 + $0xd0] sm:$0xff]  ;;  %v217_v42 = vld [vmem:[%s879_s1 + $0xe8] sm:$0xff]  ;;  %v219_v43 = vld [vmem:[%s879_s1 + $0xf8] sm:$0xff]  ;;  %s444_s7 = sshll.u32 %s891_s3, 3  ;;  %s165_s3 = sand.u32 1, %s621_s10  }
  0x18   : > { %v478_v44 = vpack.c.bf16 %v214_v41, %v212_v40  ;;  %v480_v45 = vpack.c.bf16 %v219_v43, %v217_v42  ;;  %v216_v46 = vld [vmem:[%s879_s1 + $0xe0] sm:$0xff]  ;;  %v218_v47 = vld [vmem:[%s879_s1 + $0xf0] sm:$0xff]  ;;  %s172_s16 = scalar_lea.vmem %s878_s0, %s444_s7  ;;  %s500_s18 = smul.u32 96, %s165_s3 }
  0x19   : > { %v482_v48 = vpack.c.bf16 %v218_v47, %v216_v46  ;;  %v182_v49 = vld [vmem:[%s172_s16] sm:$0xff]  ;;  %v185_v50 = vld [vmem:[%s172_s16 + $0x18] sm:$0xff]  ;;  %v183_v51 = vld [vmem:[%s172_s16 + $0x8] sm:$0xff]  ;;  %s832_s12 = scalar_lea.sflag [#allocation3], %s165_s3 }
  0x1a   : > { %463 = vmatpush1.bf16.msra.mxu0 %v462_v20  ;;  %494 = vmatpush1.bf16.msra.mxu1 %v462_v20  ;;  %v186_v52 = vld [vmem:[%s172_s16 + $0x20] sm:$0xff]  ;;  %v184_v53 = vld [vmem:[%s172_s16 + $0x10] sm:$0xff]  ;;  %v187_v54 = vld [vmem:[%s172_s16 + $0x28] sm:$0xff]  ;;  %s167_s20 = scalar_lea.vmem [#allocation2], %s500_s18 }
  0x1b   : > { %465 = vmatprep.subr.bf16.mxu0 %v464_v21  ;;  %487 = vmatprep.subr.bf16.mxu1 %v464_v21  ;;  %s350_s24 = sshll.u32 %s167_s20, 4  ;;  %s828_s24 = int_to_ptr.vmem [resolvable:$true] %s350_s24 }
  0x1c   : > { %s559_s28 = scalar_lea.vmem %s828_s24, 1536  ;;  %p566_p1 = scmp.lt.s32.totalorder %s828_s24, %s564_s30 }
  0x1d   : > { %p560_p12 = scmp.ne.s32.totalorder %s828_s24, %s559_s28  ;;  %p567_p2 = scmp.lt.s32.totalorder %s565_s4, %s559_s28 }
  0x1e   : > { %467 = vmatpush1.bf16.msra.mxu0 %v466_v26  ;;  %495 = vmatpush1.bf16.msra.mxu1 %v466_v26 }
  0x1f   : > { %469 = vmatprep.subr.bf16.mxu0 %v468_v27  ;;  %488 = vmatprep.subr.bf16.mxu1 %v468_v27  ;;  %p561_p13 = pnand %p560_p12, %p698_p4  ;;  %p568_p3 = por %p567_p2, %p566_p1 }
  0x21   : > { %p562_p0 = pneg %p561_p13 }
  0x22   : > { %471 = vmatpush1.bf16.msra.mxu0 %v470_v32  ;;  %496 = vmatpush1.bf16.msra.mxu1 %v470_v32 }
  0x23   : > { %473 = vmatprep.subr.bf16.mxu0 %v472_v33  ;;  %489 = vmatprep.subr.bf16.mxu1 %v472_v33  ;;  %p569_p5 = pnand %p568_p3, %p562_p0 }
  0x26   : > { %475 = vmatpush1.bf16.msra.mxu0 %v474_v38  ;;  %497 = vmatpush1.bf16.msra.mxu1 %v474_v38 }
  0x27   : > { %477 = vmatprep.subr.bf16.mxu0 %v476_v39  ;;  %490 = vmatprep.subr.bf16.mxu1 %v476_v39 }
  0x2a   : > { %479 = vmatpush1.bf16.msra.mxu0 %v478_v44  ;;  %498 = vmatpush1.bf16.msra.mxu1 %v478_v44 }
  0x2b   : > { %481 = vmatprep.subr.bf16.mxu0 %v480_v45  ;;  %491 = vmatprep.subr.bf16.mxu1 %v480_v45 }
  0x2e   : > { %483 = vmatpush1.bf16.msra.mxu0 %v482_v48  ;;  %499 = vmatpush1.bf16.msra.mxu1 %v482_v48 }
  0x31   : > { %285 = vmatmul.mubr.f32.vlgmr.msra.gmra.mrb[0].mxu0 %v182_v49  ;;  %303 = vmatmul.mubr.f32.vlgmr.msra.gmra.mrb[0].mxu1 %v185_v50 }
  0x32   : > { %290 = vmatprep.mubr.f32.mxu0 %v639_v7  ;;  %308 = vmatprep.mubr.f32.mxu1 %v639_v7 }
  0x35   : > { %291 = vmatmul.mubr.f32.gmra.mrb[2].mxu0 %v183_v51  ;;  %309 = vmatmul.mubr.f32.gmra.mrb[2].mxu1 %v186_v52 }
  0x36   : > { %296 = vmatprep.mubr.f32.mxu0 %v639_v7  ;;  %314 = vmatprep.mubr.f32.mxu1 %v639_v7 }
  0x39   : > { %297 = vmatmul.mubr.f32.gmra.mrb[4].mxu0 %v184_v53  ;;  %315 = vmatmul.mubr.f32.gmra.mrb[4].mxu1 %v187_v54 }
 0x104   : > { %v286_v55 = vpop.f32.mrb[0].mxu0  ;;  %v304_v56 = vpop.f32.mrb[0].mxu1 }
 0x105   : > { %321 = vst [vmem:[%s167_s20] sm:$0xff] %v286_v55  ;;  %327 = vst [vmem:[%s167_s20 + $0x30] sm:$0xff] %v304_v56  ;;  %v288_v57 = vpop.f32.mrb[1].mxu0  ;;  %v306_v58 = vpop.f32.mrb[1].mxu1 }
 0x106   : > { %322 = vst [vmem:[%s167_s20 + $0x8] sm:$0xff] %v288_v57  ;;  %328 = vst [vmem:[%s167_s20 + $0x38] sm:$0xff] %v306_v58 }
 0x108   : > { %v292_v59 = vpop.f32.mrb[2].mxu0  ;;  %v310_v60 = vpop.f32.mrb[2].mxu1 }
 0x109   : > { %323 = vst [vmem:[%s167_s20 + $0x10] sm:$0xff] %v292_v59  ;;  %329 = vst [vmem:[%s167_s20 + $0x40] sm:$0xff] %v310_v60  ;;  %v294_v61 = vpop.f32.mrb[3].mxu0  ;;  %v312_v62 = vpop.f32.mrb[3].mxu1 }
 0x10a   : > { %324 = vst [vmem:[%s167_s20 + $0x18] sm:$0xff] %v294_v61  ;;  %330 = vst [vmem:[%s167_s20 + $0x48] sm:$0xff] %v312_v62 }
 0x10c   : > { %v298_v63 = vpop.f32.mrb[4].mxu0  ;;  %v316_v0 = vpop.f32.mrb[4].mxu1 }
 0x10d   : > { %325 = vst [vmem:[%s167_s20 + $0x20] sm:$0xff] %v298_v63  ;;  %331 = vst [vmem:[%s167_s20 + $0x50] sm:$0xff] %v316_v0  ;;  %v300_v1 = vpop.f32.mrb[5].mxu0  ;;  %v318_v2 = vpop.f32.mrb[5].mxu1 }
 0x10e   : > { %326 = vst [vmem:[%s167_s20 + $0x28] sm:$0xff] %v300_v1  ;;  %332 = vst [vmem:[%s167_s20 + $0x58] sm:$0xff] %v318_v2 }
 0x10f   : > { %572 = shalt.err (!%p569_p5)
}
 0x110   : > { %s573_s5 = scalar_lea.hbm %s826_s27, 1536  ;;  %s577_s8 = scalar_lea.hbm %s880_s2, 3072 }
 0x111   : > { %p574_p6 = scmp.ne.s32.totalorder %s826_s27, %s573_s5  ;;  %p578_p10 = scmp.lt.u32.totalorder %s826_s27, %s880_s2 }
 0x112   : > { %p579_p11 = scmp.lt.u32.totalorder %s577_s8, %s573_s5  ;;  %p581_p13 = scmp.lt.u32.totalorder %s573_s5, %s826_s27 }
 0x113   : > { %p575_p7 = pnand %p574_p6, %p698_p4 }
 0x114   : > { %p580_p12 = por %p579_p11, %p578_p10 }
 0x115   : > { %p576_p9 = pneg %p575_p7 }
 0x116   : > { %p582_p0 = por %p581_p13, %p580_p12 }
 0x118   : > { %p583_p1 = pnand %p582_p0, %p576_p9 }
 0x11a   : > { %586 = shalt.err (!%p583_p1)
}
 0x11b   : > { %s641_s3 = smov 256   ;;  %s642_s18 = smov 16  }
 0x11c   : > { %501 = dma.vmem_to_hbm [thread:$0]  (%p698_p4), %s828_s24, 1536, %s826_s27, %s832_s12, %s641_s3, %s641_s3, %s642_s18  }
 0x11d PF: > { %p507_p2 = scmp.ge.s32.totalorder %s637_s14, 2  ;;  %s365_s20 = sand.u32 1, %s617_s9  }
 0x11e   : > { %s366_s23 = scalar_lea.sflag [#allocation3], %s365_s20 }
 0x11f   : > { %p504_p3 = pnand %p507_p2, %p705_p8 }
 0x121   : > { %612 = dma.done.wait (!%p504_p3), %s366_s23, 1536  }
 0x122   : > { %614 = vsyncadd (!%p504_p3), %s366_s23, 4294965760  ;;  %s15_s14 = sadd.s32 1, %s637_s14   ;;  %s883_s9 = smov %s621_s10 }
 0x123   : > { %p12_p5 = scmp.ge.s32.totalorder %s15_s14, 4   ;;  %s884_s10 = smov %s625_s11 }
 0x124   : > { %s885_s11 = smov %s711_s22  ;;  %s886_s12 = smov %s633_s13 }
 0x125   : > { %s887_s13 = smov %s889_s17  ;;  %14 = sbr.rel (!%p12_p5) target bundleno = 4 (0x4), region = 66 }
 0x12c   :  { %371 = vsyncpa [#allocation3], 1 }
 0x12d   :  { %373 = vsyncpa [#allocation3 + $0x1], 1 }

</bundles_post_ra>
